<compile_context>
chip_gen: v5e
topology: v5e:2x2
jax: 0.10.0
libtpu: 0.0.40
codegen_flags: <defaults>
</compile_context>

<pallas_src>
import functools

import jax
import jax.numpy as jnp
from jax.experimental import pallas as pl
from jax.experimental.pallas import tpu as pltpu


def _reward_kernel_vmem_table(tok_ref, emb_ref, w_ref, b_ref, out_ref, gathered, *, tb):
    """Small-table fast path: the whole wte table is resident in VMEM."""
    # tok_ref : SMEM (B_pad,)  int32 -- last token ids (scalar prefetch)
    # emb_ref : VMEM (V, H)          -- full wte table (same block every step)
    # w_ref   : VMEM (1, H)    f32   -- reward head weight, lane-dense
    # b_ref   : SMEM (1,)      f32   -- reward head bias
    # out_ref : VMEM (TB, 1)   f32   -- rewards for this batch tile
    # gathered: VMEM (TB, H)         -- sublane-dense gather buffer
    i = pl.program_id(0)
    base = i * tb
    for r in range(tb):  # TB is small & static -> unrolled dynamic-row slices
        tok = tok_ref[base + r]
        gathered[pl.ds(r, 1), :] = emb_ref[pl.ds(tok, 1), :]
    g = gathered[...].astype(jnp.float32)
    w = w_ref[...].astype(jnp.float32)
    out_ref[...] = jnp.sum(g * w, axis=-1, keepdims=True) + b_ref[0]


def _reward_kernel_hbm_gather(tok_ref, emb_hbm, w_ref, b_ref, out_ref,
                              gathered, sems, *, tb):
    """Large-table path: wte stays in HBM; TB row-gather DMAs per grid step."""
    # emb_hbm : HBM (V, H) -- never copied whole
    # gathered: VMEM (TB, H), sems: DMA (TB,)
    i = pl.program_id(0)
    base = i * tb
    copies = []
    for r in range(tb):
        cp = pltpu.make_async_copy(
            emb_hbm.at[pl.ds(tok_ref[base + r], 1), :],   # (1, H) row in HBM
            gathered.at[pl.ds(r, 1), :],                  # (1, H) VMEM slot
            sems.at[r],
        )
        cp.start()
        copies.append(cp)
    for cp in copies:
        cp.wait()
    g = gathered[...].astype(jnp.float32)
    w = w_ref[...].astype(jnp.float32)
    out_ref[...] = jnp.sum(g * w, axis=-1, keepdims=True) + b_ref[0]


def reward_model_forward(input_ids, wte, w_head, b_head, *, tb=None,
                         vmem_table_bytes_max=4 << 20):
    """input_ids: (B, S) int; wte: (V, H); w_head: (1, H); b_head: (1,). Returns (B,) f32."""
    B, _ = input_ids.shape
    V, H = wte.shape
    emb_dtype = wte.dtype
    emb_itemsize = jnp.dtype(emb_dtype).itemsize

    # Clamp ids so an out-of-range token can never turn into an OOB row access.
    last_tokens = jnp.clip(input_ids[:, -1].astype(jnp.int32), 0, V - 1)

    # Head params in kernel layout: lane-dense (1, H) weight, scalar bias -> SMEM.
    w = w_head.reshape(1, H).astype(jnp.float32)
    b = b_head.reshape(1).astype(jnp.float32)

    # Batch tile TB: sublane-aligned, bounded so TB*H*itemsize stays a few MiB
    # (v7x has 64 MiB VMEM / 32 MiB scoped default; keep double-buffer headroom).
    if tb is None:
        if B <= 8:
            tb = B
        else:
            tb = 8
            while tb * 2 <= 256 and (tb * 2) * H * emb_itemsize <= (4 << 20):
                tb *= 2
    n_tiles = pl.cdiv(B, tb)
    b_pad = n_tiles * tb
    if b_pad != B:
        last_tokens = jnp.pad(last_tokens, (0, b_pad - B))  # pad rows use token 0 (valid)

    use_vmem_table = (V * H * emb_itemsize) <= vmem_table_bytes_max

    if use_vmem_table:
        kernel = functools.partial(_reward_kernel_vmem_table, tb=tb)
        in_specs = [
            pl.BlockSpec((V, H), lambda i, tok: (0, 0)),            # whole table, resident in VMEM
            pl.BlockSpec((1, H), lambda i, tok: (0, 0)),            # head weight
            pl.BlockSpec(memory_space=pltpu.MemorySpace.SMEM),      # head bias
        ]
        scratch_shapes = [pltpu.VMEM((tb, H), emb_dtype)]
    else:
        kernel = functools.partial(_reward_kernel_hbm_gather, tb=tb)
        in_specs = [
            pl.BlockSpec(memory_space=pl.ANY),                      # wte stays in HBM
            pl.BlockSpec((1, H), lambda i, tok: (0, 0)),
            pl.BlockSpec(memory_space=pltpu.MemorySpace.SMEM),
        ]
        scratch_shapes = [
            pltpu.VMEM((tb, H), emb_dtype),
            pltpu.SemaphoreType.DMA((tb,)),
        ]

    out = pl.pallas_call(
        kernel,
        out_shape=jax.ShapeDtypeStruct((b_pad, 1), jnp.float32),
        grid_spec=pltpu.PrefetchScalarGridSpec(
            num_scalar_prefetch=1,                 # last_tokens land in SMEM
            grid=(n_tiles,),
            in_specs=in_specs,
            out_specs=pl.BlockSpec((tb, 1), lambda i, tok: (i, 0)),
            scratch_shapes=scratch_shapes,
        ),
        compiler_params=pltpu.CompilerParams(
            # Batch tiles are independent: on v7x the 2 TensorCores split them,
            # doubling in-flight gather DMAs for the HBM path.
            dimension_semantics=("parallel",),
        ),
    )(last_tokens, wte, w, b)

    return out[:B, 0]                               # squeeze(-1) -> (B,)


if __name__ == "__main__":
    # Small shapes consistent with the module: batch=2, seq=8, vocab=64, hidden=32.
    B, S, V, H = 2, 8, 64, 32

    key = jax.random.PRNGKey(0)
    k_ids, k_wte, k_w, k_b = jax.random.split(key, 4)

    input_ids = jax.random.randint(k_ids, (B, S), 0, V, dtype=jnp.int32)
    wte = jax.random.normal(k_wte, (V, H), dtype=jnp.float32) * 0.02
    w_head = jax.random.normal(k_w, (1, H), dtype=jnp.float32) * 0.1   # nn.Linear(H,1).weight
    b_head = jax.random.normal(k_b, (1,), dtype=jnp.float32) * 0.1     # nn.Linear(H,1).bias

    # Pure-JAX reference.
    last_tokens = input_ids[:, -1]
    ref = (wte[last_tokens] @ w_head.T + b_head)[:, 0]

    # Fast path (table fits VMEM at these shapes).
    rewards = jax.block_until_ready(
        reward_model_forward(input_ids, wte, w_head, b_head)
    )
    assert rewards.shape == (B,)
    assert jnp.allclose(rewards, ref, atol=1e-5, rtol=1e-5), (rewards, ref)

    # Force the HBM row-gather path too (production vocab sizes).
    rewards_hbm = jax.block_until_ready(
        reward_model_forward(input_ids, wte, w_head, b_head,
                             vmem_table_bytes_max=0)
    )
    assert rewards_hbm.shape == (B,)
    assert jnp.allclose(rewards_hbm, ref, atol=1e-5, rtol=1e-5), (rewards_hbm, ref)

    print("KERNEL_OK")
</pallas_src>

<mosaic_0001>
module attributes {stable_mosaic.version = 11 : i64} {
  func.func @_reward_kernel_vmem_table(%arg0: i32, %arg1: memref<2xi32, #tpu.memory_space<smem>>, %arg2: memref<64x32xf32, #tpu.memory_space<vmem>>, %arg3: memref<1x32xf32, #tpu.memory_space<vmem>>, %arg4: memref<1xf32, #tpu.memory_space<smem>>, %arg5: memref<2x1xf32, #tpu.memory_space<vmem>>, %arg6: memref<2x32xf32, #tpu.memory_space<vmem>>) attributes {dimension_semantics = [#tpu.dimension_semantics<parallel>], iteration_bounds = array<i64: 1>, scalar_prefetch = 1 : i64, scratch_operands = 1 : i64, tpu.core_type = #tpu.core_type<tc>, window_params = [{pipeline_mode = #tpu.pipeline_mode<synchronous>, transform_indices = @transform_0, window_bounds = array<i64: 64, 32>}, {pipeline_mode = #tpu.pipeline_mode<synchronous>, transform_indices = @transform_1, window_bounds = array<i64: 1, 32>}, {transform_indices = @transform_2, window_bounds = array<i64: 1>}, {transform_indices = @transform_3, window_bounds = array<i64: 2, 1>}]} {
    %c2_i32 = arith.constant 2 : i32
    %0 = arith.muli %arg0, %c2_i32 : i32
    %c0_i32 = arith.constant 0 : i32
    %1 = arith.addi %0, %c0_i32 : i32
    %2 = arith.index_cast %1 : i32 to index
    %3 = memref.load %arg1[%2] : memref<2xi32, #tpu.memory_space<smem>>
    %4 = arith.index_cast %3 : i32 to index
    %c0 = arith.constant 0 : index
    %5 = vector.load %arg2[%4, %c0] : memref<64x32xf32, #tpu.memory_space<vmem>>, vector<1x32xf32>
    %c0_0 = arith.constant 0 : index
    %c0_1 = arith.constant 0 : index
    %6 = vector.load %arg6[%c0_0, %c0_1] : memref<2x32xf32, #tpu.memory_space<vmem>>, vector<1x32xf32>
    tpu.vector_store %arg6[%c0_0, %c0_1], %5 {strides = array<i32>} : memref<2x32xf32, #tpu.memory_space<vmem>>, vector<1x32xf32>,
    %c1_i32 = arith.constant 1 : i32
    %7 = arith.addi %0, %c1_i32 : i32
    %8 = arith.index_cast %7 : i32 to index
    %9 = memref.load %arg1[%8] : memref<2xi32, #tpu.memory_space<smem>>
    %10 = arith.index_cast %9 : i32 to index
    %c0_2 = arith.constant 0 : index
    %11 = vector.load %arg2[%10, %c0_2] : memref<64x32xf32, #tpu.memory_space<vmem>>, vector<1x32xf32>
    %c1 = arith.constant 1 : index
    %c0_3 = arith.constant 0 : index
    %12 = vector.load %arg6[%c1, %c0_3] : memref<2x32xf32, #tpu.memory_space<vmem>>, vector<1x32xf32>
    tpu.vector_store %arg6[%c1, %c0_3], %11 {strides = array<i32>} : memref<2x32xf32, #tpu.memory_space<vmem>>, vector<1x32xf32>,
    %c0_4 = arith.constant 0 : index
    %c0_5 = arith.constant 0 : index
    %13 = vector.load %arg6[%c0_4, %c0_5] : memref<2x32xf32, #tpu.memory_space<vmem>>, vector<2x32xf32>
    %c0_6 = arith.constant 0 : index
    %c0_7 = arith.constant 0 : index
    %14 = vector.load %arg3[%c0_6, %c0_7] : memref<1x32xf32, #tpu.memory_space<vmem>>, vector<1x32xf32>
    %15 = vector.broadcast %14 : vector<1x32xf32> to vector<2x32xf32>
    %16 = arith.mulf %13, %15 : vector<2x32xf32>
    %cst = arith.constant dense<0.000000e+00> : vector<2xf32>
    %17 = vector.multi_reduction <add>, %16, %cst [1] : vector<2x32xf32> to vector<2xf32>
    %18 = vector.shape_cast %17 : vector<2xf32> to vector<2x1xf32>
    %c0_8 = arith.constant 0 : index
    %19 = memref.load %arg4[%c0_8] : memref<1xf32, #tpu.memory_space<smem>>
    %20 = vector.broadcast %19 : f32 to vector<2x1xf32>
    %21 = arith.addf %18, %20 : vector<2x1xf32>
    %c0_9 = arith.constant 0 : index
    %c0_10 = arith.constant 0 : index
    %22 = vector.load %arg5[%c0_9, %c0_10] : memref<2x1xf32, #tpu.memory_space<vmem>>, vector<2x1xf32>
    tpu.vector_store %arg5[%c0_9, %c0_10], %21 {strides = array<i32>} : memref<2x1xf32, #tpu.memory_space<vmem>>, vector<2x1xf32>,
    return
  }
  func.func @transform_0(%arg0: i32, %arg1: memref<2xi32, #tpu.memory_space<smem>>) -> (i32, i32) {
    %c0_i32 = arith.constant 0 : i32
    %c0_i32_0 = arith.constant 0 : i32
    %c0_i32_1 = arith.constant 0 : i32
    return %c0_i32, %c0_i32_0 : i32, i32
  }
  func.func @transform_1(%arg0: i32, %arg1: memref<2xi32, #tpu.memory_space<smem>>) -> (i32, i32) {
    %c0_i32 = arith.constant 0 : i32
    %c0_i32_0 = arith.constant 0 : i32
    %c0_i32_1 = arith.constant 0 : i32
    return %c0_i32, %c0_i32_0 : i32, i32
  }
  func.func @transform_2(%arg0: i32, %arg1: memref<2xi32, #tpu.memory_space<smem>>) -> i32 {
    %c0_i32 = arith.constant 0 : i32
    %c0_i32_0 = arith.constant 0 : i32
    return %c0_i32 : i32
  }
  func.func @transform_3(%arg0: i32, %arg1: memref<2xi32, #tpu.memory_space<smem>>) -> (i32, i32) {
    %c0_i32 = arith.constant 0 : i32
    %c0_i32_0 = arith.constant 0 : i32
    return %arg0, %c0_i32 : i32, i32
  }
}

</mosaic_0001>

<bundles_post_ra>
// kernel: tpu_custom_call.1
= control target key start
LH: loop header
LB: loop body
LE: loop exit
PB: predicated region body
PF: predicated region fallthrough
CT: control target
= control target key end

     0   :  { %s73_s18 = smov [#allocation4]   ;;  %s117_s0 = inlined_call_operand.vmem [shape: s32[2], index: 0, kind: input, shape index: {}]   ;;  %s118_s1 = inlined_call_operand.vmem [shape: f32[64,32], index: 1, kind: input, shape index: {}]   ;;  %s119_s2 = inlined_call_operand.vmem [shape: f32[1,32], index: 2, kind: input, shape index: {}]   ;;  %s120_s3 = inlined_call_operand.<no memory space> [shape: f32[1], index: 3, kind: input, shape index: {}]   ;;  %s121_s4 = inlined_call_operand.vmem [shape: f32[2,1], index: 4, kind: output, shape index: {}]  }
   0x1   :  { %s10_s17 = sshll.u32 %s117_s0, 4  ;;  %s11_s17 = int_to_ptr.vmem [resolvable:$true] %s10_s17 }
   0x2   :  { %13 = dma.vmem_to_smem %s11_s17, 16, %s73_s18, [#allocation3] }
   0x3   :  { %71 = dma.done.wait [#allocation3], 16 }
   0x4   :  { %72 = vsyncadd [#allocation3], 4294967280 }
   0x5   :  { %17 = sfence }
   0x6   :  { %s25_s19 = sld [smem:[#allocation4]]  ;;  %vm28_vm0 = vcmask 253952   ;;  %v58_v2 = vld [vmem:[%s119_s2] ss:$0 sm:$0xff]  ;;  %vm41_vm1 = vcmask 254976   ;;  %v46_v6 = vstv %s120_s3  ;;  %vm48_vm2 = vcmask 1024  }
   0x7   :  { %s56_s20 = sld [smem:[#allocation4 + $0x1]] }
   0xc   :  { %s26_s23 = scalar_lea.vmem %s118_s1, %s25_s19 }
   0xd   :  { %v27_v0 = vld [vmem:[%s26_s23] sm:$0x1]  ;;  %s32_s26 = scalar_lea.vmem %s118_s1, %s56_s20 }
   0xe   :  { %29 = vst.msk [vmem:[#allocation2] sm:$0x1] %vm28_vm0, %v27_v0  ;;  %v33_v1 = vld [vmem:[%s32_s26] sm:$0x1] }
   0xf   :  { %34 = vst.msk [vmem:[#allocation2 + $0x1] sm:$0x1] %vm28_vm0, %v33_v1 }
  0x16   :  { %v35_v3 = vld [vmem:[#allocation2] sm:$0x3] }
  0x17   :  { %v40_v4 = vmul.f32 %v58_v2, %v35_v3 }
  0x19   :  { %v42_v5 = vsel %vm41_vm1, %v40_v4, 0.0 }
  0x1a   :  { %43 = vadd.xlane.f32.xlu0 %v42_v5 }
  0x8d   :  { %v44_v7 = vpop.xlane.xlu0 %43 }
  0x8e   :  { %v47_v8 = vadd.f32 %v46_v6, %v44_v7 }
  0x90   :  { %49 = vst.msk [vmem:[%s121_s4] sm:$0x3] %vm48_vm2, %v47_v8 }

</bundles_post_ra>
